<compile_context>
chip_gen: v5e
topology: v5e:2x2
jax: 0.10.0
libtpu: 0.0.40
codegen_flags: <defaults>
</compile_context>

<pallas_src>
import functools
import math

import jax
import jax.numpy as jnp
from jax.experimental import pallas as pl
from jax.experimental.pallas import tpu as pltpu

# ---- problem sizes (small, consistent with the module) ----
B = 2            # batch
N = 8            # set size / sequence length
DIM_Q = 16       # dim_Q (dim_K is never used by forward)
DIM_V = 32       # dim_V
NUM_HEADS = 4
DIM_SPLIT = DIM_V // NUM_HEADS
LN_EPS = 1e-5    # nn.LayerNorm default eps
SINK_EPS = 1.0   # SinkhornDistance eps (module hardcodes eps = 1)
# SinkhornDistance max_iter = 1 -> exactly one u update and one v update.


def mabsink_kernel(x_ref, wq_ref, wo_ref, vec_ref, o_ref, *, bb, ln=True):
    """One batch block (bb batch elements, all heads) in a single shot.

    x_ref  : (bb*N, DIM_Q)  flattened inputs, row = j*N + n (local batch j)
    wq_ref : (DIM_Q, DIM_V) fc_q weight
    wo_ref : (DIM_V, DIM_V) fc_o weight
    vec_ref: (6, DIM_V)     rows = [bq, bo, ln0_g, ln0_b, ln1_g, ln1_b]
    o_ref  : (bb*N, DIM_V)
    """
    n_heads, ds, n = NUM_HEADS, DIM_SPLIT, N

    vecs = vec_ref[...]
    bq, bo = vecs[0:1], vecs[1:2]
    g0, b0 = vecs[2:3], vecs[3:4]
    g1, b1 = vecs[4:5], vecs[5:6]

    # fc_q: one lane-dense (bb*N, DIM_Q) @ (DIM_Q, DIM_V) MXU push.
    qp = jnp.dot(x_ref[...], wq_ref[...],
                 preferred_element_type=jnp.float32) + bq            # (bb*N, DIM_V)
    qp3 = qp.reshape(bb, n, DIM_V)

    # head-major groups (G, N, ds), group g = h*bb + j  (== torch.cat(split(.,2),0))
    q = jnp.concatenate(
        [qp3[:, :, h * ds:(h + 1) * ds] for h in range(n_heads)], axis=0)  # (G,N,ds)

    # ---- Sinkhorn attention, eps=1, max_iter=1, K_ = V_ = Q_ ----
    # cost: C = -(Q_/V^0.25)(Q_/V^0.25)^T  =>  -C = Q_ Q_^T / sqrt(dim_V)
    neg_c = jnp.einsum('gnd,gmd->gnm', q, q,
                       preferred_element_type=jnp.float32) * (1.0 / math.sqrt(DIM_V))
    log_mu = math.log(1.0 / n + 1e-8)            # log(mu + 1e-8), mu = nu = 1/N
    # u = eps*(log_mu - logsumexp(M(C,0,0), -1));   M(C,0,0) = -C   (eps = 1)
    m1 = jnp.max(neg_c, axis=-1, keepdims=True)
    u = log_mu - (m1 + jnp.log(jnp.sum(jnp.exp(neg_c - m1),
                                       axis=-1, keepdims=True)))      # (G,N,1)
    # v = eps*(log_mu - logsumexp(M(C,u,0)^T, -1))  -> reduce over rows of (-C + u)
    t = neg_c + u
    m2 = jnp.max(t, axis=-2, keepdims=True)                           # (G,1,N)
    e2 = jnp.exp(t - m2)                                              # reused below
    v = log_mu - (m2 + jnp.log(jnp.sum(e2, axis=-2, keepdims=True)))  # (G,1,N)
    # A = exp(M(C,u,v)) * n = exp(t + v) * n == e2 * exp(v + m2) * n
    # (same max shift; saves a third full (G,N,N) exp on the critical path)
    a = e2 * (jnp.exp(v + m2) * float(n))                             # (G,N,N)
    o_heads = q + jnp.einsum('gnm,gmd->gnd', a, q,
                             preferred_element_type=jnp.float32)      # (G,N,ds)

    # ---- merge heads back onto the 32-lane feature axis through the MXU ----
    # one-hot placement em[h][d, h*ds + d] = 1, generated in-kernel (no DMA).
    col = jax.lax.broadcasted_iota(jnp.int32, (ds, DIM_V), 1)
    row = jax.lax.broadcasted_iota(jnp.int32, (ds, DIM_V), 0)
    parts = []
    for h in range(n_heads):
        em_h = (col == h * ds + row).astype(jnp.float32)
        parts.append(jnp.dot(o_heads[h * bb:(h + 1) * bb].reshape(bb * n, ds), em_h,
                             preferred_element_type=jnp.float32))     # (bb*N, DIM_V)
    while len(parts) > 1:                       # balanced tree sum (no serial FIFO chain)
        parts = [parts[i] + parts[i + 1] if i + 1 < len(parts) else parts[i]
                 for i in range(0, len(parts), 2)]
    o1 = parts[0]                                                     # (bb*N, DIM_V)

    def layer_norm(x, g, b):
        mu = jnp.mean(x, axis=-1, keepdims=True)
        d = x - mu
        var = jnp.mean(d * d, axis=-1, keepdims=True)
        return d * jax.lax.rsqrt(var + LN_EPS) * g + b

    if ln:
        o1 = layer_norm(o1, g0, b0)                                   # ln0
    ff = jnp.dot(o1, wo_ref[...], preferred_element_type=jnp.float32) + bo
    o2 = o1 + jnp.maximum(ff, 0.0)                                    # O + relu(fc_o(O))
    if ln:
        o2 = layer_norm(o2, g1, b1)                                   # ln1

    o_ref[...] = o2


def prepare_params(params):
    """One-time parameter layout prep (hoisted out of the per-call forward)."""
    wq, bq, wo, bo, g0, b0, g1, b1 = params
    vecs = jnp.stack([bq, bo, g0, b0, g1, b1], axis=0)                # (6, DIM_V)
    return (jnp.asarray(wq, jnp.float32),
            jnp.asarray(wo, jnp.float32),
            jnp.asarray(vecs, jnp.float32))


def mabsink_forward(Q, K, prepared, *, batch_block=None, ln=True):
    """Pallas forward of MABSINK_Simplified.

    K is accepted only for signature parity with the PyTorch module — its
    forward never reads it (K_ = V_ = Q_), so it is ignored here too.

    batch_block:
      * None (default): whole batch fused into a single grid step (grid=(1,)).
        Best on every generation (v5e/v6e/v7x) at small B — the ~0.35 us /
        ~600-cycle per-step pipeline overhead dominates this tiny problem, and
        splitting a latency-bound kernel across cores only duplicates prologue
        and weight DMAs.
      * k (must divide B): grid=(B//k,) with "parallel" semantics.  On v7x
        (2 TensorCores/chip) use batch_block = cdiv(B, 2), and only once the
        per-block work clearly exceeds the per-step overhead.
    """
    wq, wo, vecs = prepared
    b_dim, n, d_q = Q.shape
    assert (n, d_q) == (N, DIM_Q) and wq.shape == (DIM_Q, DIM_V)
    bb = b_dim if batch_block is None else batch_block
    assert b_dim % bb == 0
    nblk = b_dim // bb

    x2 = Q.reshape(b_dim * n, d_q).astype(jnp.float32)   # free bitcast-style reshape

    def const_spec(shape):
        return pl.BlockSpec(shape, lambda i, _n=len(shape): (0,) * _n)

    out = pl.pallas_call(
        functools.partial(mabsink_kernel, bb=bb, ln=ln),
        out_shape=jax.ShapeDtypeStruct((b_dim * n, DIM_V), jnp.float32),
        grid=(nblk,),
        in_specs=[
            pl.BlockSpec((bb * n, d_q), lambda i: (i, 0)),   # x: one batch block / step
            const_spec((DIM_Q, DIM_V)),                      # wq (stays resident)
            const_spec((DIM_V, DIM_V)),                      # wo
            const_spec((6, DIM_V)),                          # packed bq/bo/ln vectors
        ],
        out_specs=pl.BlockSpec((bb * n, DIM_V), lambda i: (i, 0)),   # lane-dense 2D slab
        compiler_params=pltpu.CompilerParams(dimension_semantics=("parallel",)),
    )(x2, wq, wo, vecs)
    return out.reshape(b_dim, n, DIM_V)


# ------------------------- pure-JAX reference (mirrors the PyTorch code) -----------
def _logsumexp(x, axis):
    m = jnp.max(x, axis=axis, keepdims=True)
    return jnp.squeeze(m, axis) + jnp.log(jnp.sum(jnp.exp(x - m), axis=axis))


def mabsink_reference(Q, K, params, *, ln=True):
    wq, bq, wo, bo, g0, b0, g1, b1 = params
    Qp = Q @ wq + bq
    sqrt_v = math.sqrt(math.sqrt(DIM_V))
    Q_ = jnp.concatenate(jnp.split(Qp, NUM_HEADS, axis=2), axis=0)     # (H*B, N, ds)
    K_ = Q_
    V_ = Q_
    C = -jnp.einsum('bnd,bmd->bnm', Q_ / sqrt_v, K_ / sqrt_v)          # dotmat, div=1
    n = Q_.shape[1]
    log_mu = jnp.log(1.0 / n + 1e-8)
    u = jnp.zeros(Q_.shape[:2], jnp.float32)
    v = jnp.zeros(Q_.shape[:2], jnp.float32)
    M = lambda u, v: (-C + u[:, :, None] + v[:, None, :]) / SINK_EPS
    u = SINK_EPS * (log_mu - _logsumexp(M(u, v), -1)) + u              # max_iter = 1
    v = SINK_EPS * (log_mu - _logsumexp(jnp.swapaxes(M(u, v), -1, -2), -1)) + v
    pi = jnp.exp(M(u, v))
    A = pi * n
    O_ = Q_ + jnp.einsum('bnm,bmd->bnd', A, V_)
    O = jnp.concatenate(jnp.split(O_, NUM_HEADS, axis=0), axis=2)      # (B, N, dim_V)

    def lnorm(x, g, b):
        m = jnp.mean(x, axis=-1, keepdims=True)
        var = jnp.mean((x - m) ** 2, axis=-1, keepdims=True)
        return (x - m) / jnp.sqrt(var + LN_EPS) * g + b

    if ln:
        O = lnorm(O, g0, b0)
    O = O + jax.nn.relu(O @ wo + bo)
    if ln:
        O = lnorm(O, g1, b1)
    return O


def init_params(key):
    """nn.Linear-style init U(+-1/sqrt(fan_in)); LayerNorm weight=1, bias=0."""
    ks = jax.random.split(key, 4)

    def linear(kw, kb, fan_in, fan_out):
        lim = 1.0 / math.sqrt(fan_in)
        w = jax.random.uniform(kw, (fan_in, fan_out), jnp.float32, -lim, lim)
        b = jax.random.uniform(kb, (fan_out,), jnp.float32, -lim, lim)
        return w, b

    wq, bq = linear(ks[0], ks[1], DIM_Q, DIM_V)
    wo, bo = linear(ks[2], ks[3], DIM_V, DIM_V)
    g0 = jnp.ones((DIM_V,), jnp.float32)
    b0 = jnp.zeros((DIM_V,), jnp.float32)
    g1 = jnp.ones((DIM_V,), jnp.float32)
    b1 = jnp.zeros((DIM_V,), jnp.float32)
    return (wq, bq, wo, bo, g0, b0, g1, b1)


if __name__ == "__main__":
    key = jax.random.PRNGKey(0)
    kq, kk, kp = jax.random.split(key, 3)
    Q = jax.random.normal(kq, (B, N, DIM_Q), jnp.float32)
    K = jax.random.normal(kk, (B, N, DIM_Q), jnp.float32)   # unused by the module's forward
    params = init_params(kp)
    prepared = prepare_params(params)                        # one-time layout prep

    out = mabsink_forward(Q, K, prepared)                    # default: batch fused, grid=(1,)
    jax.block_until_ready(out)

    ref = mabsink_reference(Q, K, params)
    assert out.shape == (B, N, DIM_V)
    assert jnp.allclose(out, ref, atol=1e-4, rtol=1e-4), \
        float(jnp.max(jnp.abs(out - ref)))

    # Exercise the multi-block path too (correctness check only; at B=2 the
    # fused grid=(1,) default above is the faster choice on every generation).
    out2 = mabsink_forward(Q, K, prepared, batch_block=1)
    jax.block_until_ready(out2)
    assert jnp.allclose(out2, ref, atol=1e-4, rtol=1e-4)

    print("KERNEL_OK")
</pallas_src>

<mosaic_0001>
module attributes {stable_mosaic.version = 11 : i64} {
  func.func @mabsink_kernel(%arg0: i32, %arg1: memref<16x16xf32, #tpu.memory_space<vmem>>, %arg2: memref<16x32xf32, #tpu.memory_space<vmem>>, %arg3: memref<32x32xf32, #tpu.memory_space<vmem>>, %arg4: memref<6x32xf32, #tpu.memory_space<vmem>>, %arg5: memref<16x32xf32, #tpu.memory_space<vmem>>) attributes {dimension_semantics = [#tpu.dimension_semantics<parallel>], iteration_bounds = array<i64: 1>, scalar_prefetch = 0 : i64, scratch_operands = 0 : i64, tpu.core_type = #tpu.core_type<tc>, window_params = [{transform_indices = @transform_0, window_bounds = array<i64: 16, 16>}, {pipeline_mode = #tpu.pipeline_mode<synchronous>, transform_indices = @transform_1, window_bounds = array<i64: 16, 32>}, {pipeline_mode = #tpu.pipeline_mode<synchronous>, transform_indices = @transform_2, window_bounds = array<i64: 32, 32>}, {pipeline_mode = #tpu.pipeline_mode<synchronous>, transform_indices = @transform_3, window_bounds = array<i64: 6, 32>}, {transform_indices = @transform_4, window_bounds = array<i64: 16, 32>}]} {
    %c0 = arith.constant 0 : index
    %c0_0 = arith.constant 0 : index
    %0 = vector.load %arg4[%c0, %c0_0] : memref<6x32xf32, #tpu.memory_space<vmem>>, vector<6x32xf32>
    %1 = vector.extract_strided_slice %0 {offsets = [0, 0], sizes = [1, 32], strides = [1, 1]} : vector<6x32xf32> to vector<1x32xf32>
    %2 = vector.extract_strided_slice %0 {offsets = [1, 0], sizes = [1, 32], strides = [1, 1]} : vector<6x32xf32> to vector<1x32xf32>
    %3 = vector.extract_strided_slice %0 {offsets = [2, 0], sizes = [1, 32], strides = [1, 1]} : vector<6x32xf32> to vector<1x32xf32>
    %4 = vector.extract_strided_slice %0 {offsets = [3, 0], sizes = [1, 32], strides = [1, 1]} : vector<6x32xf32> to vector<1x32xf32>
    %5 = vector.extract_strided_slice %0 {offsets = [4, 0], sizes = [1, 32], strides = [1, 1]} : vector<6x32xf32> to vector<1x32xf32>
    %6 = vector.extract_strided_slice %0 {offsets = [5, 0], sizes = [1, 32], strides = [1, 1]} : vector<6x32xf32> to vector<1x32xf32>
    %c0_1 = arith.constant 0 : index
    %c0_2 = arith.constant 0 : index
    %7 = vector.load %arg1[%c0_1, %c0_2] : memref<16x16xf32, #tpu.memory_space<vmem>>, vector<16x16xf32>
    %c0_3 = arith.constant 0 : index
    %c0_4 = arith.constant 0 : index
    %8 = vector.load %arg2[%c0_3, %c0_4] : memref<16x32xf32, #tpu.memory_space<vmem>>, vector<16x32xf32>
    %cst = arith.constant dense<0.000000e+00> : vector<16x32xf32>
    %9 = tpu.matmul %7, %8, %cst {dimension_numbers = #tpu.dot_dimension_numbers<[1], [0], [0], [1], [0, 0, 1, 1], [], []>} : vector<16x16xf32>, vector<16x32xf32>, vector<16x32xf32> -> vector<16x32xf32>
    %10 = vector.broadcast %1 : vector<1x32xf32> to vector<16x32xf32>
    %11 = arith.addf %9, %10 : vector<16x32xf32>
    %12 = vector.shape_cast %11 : vector<16x32xf32> to vector<2x8x32xf32>
    %13 = vector.extract_strided_slice %12 {offsets = [0, 0, 0], sizes = [2, 8, 8], strides = [1, 1, 1]} : vector<2x8x32xf32> to vector<2x8x8xf32>
    %14 = vector.extract_strided_slice %12 {offsets = [0, 0, 8], sizes = [2, 8, 8], strides = [1, 1, 1]} : vector<2x8x32xf32> to vector<2x8x8xf32>
    %15 = vector.extract_strided_slice %12 {offsets = [0, 0, 16], sizes = [2, 8, 8], strides = [1, 1, 1]} : vector<2x8x32xf32> to vector<2x8x8xf32>
    %16 = vector.extract_strided_slice %12 {offsets = [0, 0, 24], sizes = [2, 8, 8], strides = [1, 1, 1]} : vector<2x8x32xf32> to vector<2x8x8xf32>
    %17 = tpu.concatenate %13, %14, %15, %16 in 0 : vector<2x8x8xf32>, vector<2x8x8xf32>, vector<2x8x8xf32>, vector<2x8x8xf32> -> vector<8x8x8xf32>
    "tpu.trace_start"() <{level = 10 : i32, message = "gnd,gmd->gnm"}> : () -> ()
    %cst_5 = arith.constant dense<0.000000e+00> : vector<8x8x8xf32>
    %18 = tpu.matmul %17, %17, %cst_5 {dimension_numbers = #tpu.dot_dimension_numbers<[2], [2], [1], [1], [0, 0, 0, 1, 1, 1], [0], [0]>} : vector<8x8x8xf32>, vector<8x8x8xf32>, vector<8x8x8xf32> -> vector<8x8x8xf32>
    "tpu.trace_stop"() : () -> ()
    %cst_6 = arith.constant 0.176776692 : f32
    %19 = vector.broadcast %cst_6 : f32 to vector<8x8x8xf32>
    %20 = arith.mulf %18, %19 : vector<8x8x8xf32>
    %cst_7 = arith.constant dense<0xFF800000> : vector<8x8xf32>
    %21 = vector.multi_reduction <maximumf>, %20, %cst_7 [2] : vector<8x8x8xf32> to vector<8x8xf32>
    %22 = vector.shape_cast %21 : vector<8x8xf32> to vector<8x8x1xf32>
    %23 = vector.broadcast %22 : vector<8x8x1xf32> to vector<8x8x8xf32>
    %24 = arith.subf %20, %23 : vector<8x8x8xf32>
    %25 = math.exp %24 : vector<8x8x8xf32>
    %cst_8 = arith.constant dense<0.000000e+00> : vector<8x8xf32>
    %26 = vector.multi_reduction <add>, %25, %cst_8 [2] : vector<8x8x8xf32> to vector<8x8xf32>
    %27 = vector.shape_cast %26 : vector<8x8xf32> to vector<8x8x1xf32>
    %28 = math.log %27 : vector<8x8x1xf32>
    %29 = arith.addf %22, %28 : vector<8x8x1xf32>
    %cst_9 = arith.constant -2.07944155 : f32
    %30 = vector.broadcast %cst_9 : f32 to vector<8x8x1xf32>
    %31 = arith.subf %30, %29 : vector<8x8x1xf32>
    %32 = vector.broadcast %31 : vector<8x8x1xf32> to vector<8x8x8xf32>
    %33 = arith.addf %20, %32 : vector<8x8x8xf32>
    %cst_10 = arith.constant dense<0xFF800000> : vector<8x8xf32>
    %34 = vector.multi_reduction <maximumf>, %33, %cst_10 [1] : vector<8x8x8xf32> to vector<8x8xf32>
    %35 = vector.shape_cast %34 : vector<8x8xf32> to vector<8x1x8xf32>
    %36 = vector.broadcast %35 : vector<8x1x8xf32> to vector<8x8x8xf32>
    %37 = arith.subf %33, %36 : vector<8x8x8xf32>
    %38 = math.exp %37 : vector<8x8x8xf32>
    %cst_11 = arith.constant dense<0.000000e+00> : vector<8x8xf32>
    %39 = vector.multi_reduction <add>, %38, %cst_11 [1] : vector<8x8x8xf32> to vector<8x8xf32>
    %40 = vector.shape_cast %39 : vector<8x8xf32> to vector<8x1x8xf32>
    %41 = math.log %40 : vector<8x1x8xf32>
    %42 = arith.addf %35, %41 : vector<8x1x8xf32>
    %cst_12 = arith.constant -2.07944155 : f32
    %43 = vector.broadcast %cst_12 : f32 to vector<8x1x8xf32>
    %44 = arith.subf %43, %42 : vector<8x1x8xf32>
    %45 = arith.addf %44, %35 : vector<8x1x8xf32>
    %46 = math.exp %45 : vector<8x1x8xf32>
    %cst_13 = arith.constant 8.000000e+00 : f32
    %47 = vector.broadcast %cst_13 : f32 to vector<8x1x8xf32>
    %48 = arith.mulf %46, %47 : vector<8x1x8xf32>
    %49 = vector.broadcast %48 : vector<8x1x8xf32> to vector<8x8x8xf32>
    %50 = arith.mulf %38, %49 : vector<8x8x8xf32>
    "tpu.trace_start"() <{level = 10 : i32, message = "gnm,gmd->gnd"}> : () -> ()
    %cst_14 = arith.constant dense<0.000000e+00> : vector<8x8x8xf32>
    %51 = tpu.matmul %50, %17, %cst_14 {dimension_numbers = #tpu.dot_dimension_numbers<[2], [1], [1], [2], [0, 0, 0, 1, 1, 2], [0], [0]>} : vector<8x8x8xf32>, vector<8x8x8xf32>, vector<8x8x8xf32> -> vector<8x8x8xf32>
    "tpu.trace_stop"() : () -> ()
    %52 = arith.addf %17, %51 : vector<8x8x8xf32>
    %53 = tpu.iota {dimensions = array<i32: 1>} : vector<8x32xi32>
    %54 = tpu.iota {dimensions = array<i32: 0>} : vector<8x32xi32>
    %c0_i32 = arith.constant 0 : i32
    %55 = vector.broadcast %c0_i32 : i32 to vector<8x32xi32>
    %56 = arith.addi %55, %54 : vector<8x32xi32>
    %57 = arith.cmpi eq, %53, %56 : vector<8x32xi32>
    %58 = arith.extui %57 : vector<8x32xi1> to vector<8x32xi32>
    %59 = arith.sitofp %58 : vector<8x32xi32> to vector<8x32xf32>
    %60 = vector.extract_strided_slice %52 {offsets = [0, 0, 0], sizes = [2, 8, 8], strides = [1, 1, 1]} : vector<8x8x8xf32> to vector<2x8x8xf32>
    %61 = vector.shape_cast %60 : vector<2x8x8xf32> to vector<16x8xf32>
    %cst_15 = arith.constant dense<0.000000e+00> : vector<16x32xf32>
    %62 = tpu.matmul %61, %59, %cst_15 {dimension_numbers = #tpu.dot_dimension_numbers<[1], [0], [0], [1], [0, 0, 1, 1], [], []>} : vector<16x8xf32>, vector<8x32xf32>, vector<16x32xf32> -> vector<16x32xf32>
    %c8_i32 = arith.constant 8 : i32
    %63 = vector.broadcast %c8_i32 : i32 to vector<8x32xi32>
    %64 = arith.addi %63, %54 : vector<8x32xi32>
    %65 = arith.cmpi eq, %53, %64 : vector<8x32xi32>
    %66 = arith.extui %65 : vector<8x32xi1> to vector<8x32xi32>
    %67 = arith.sitofp %66 : vector<8x32xi32> to vector<8x32xf32>
    %68 = vector.extract_strided_slice %52 {offsets = [2, 0, 0], sizes = [2, 8, 8], strides = [1, 1, 1]} : vector<8x8x8xf32> to vector<2x8x8xf32>
    %69 = vector.shape_cast %68 : vector<2x8x8xf32> to vector<16x8xf32>
    %cst_16 = arith.constant dense<0.000000e+00> : vector<16x32xf32>
    %70 = tpu.matmul %69, %67, %cst_16 {dimension_numbers = #tpu.dot_dimension_numbers<[1], [0], [0], [1], [0, 0, 1, 1], [], []>} : vector<16x8xf32>, vector<8x32xf32>, vector<16x32xf32> -> vector<16x32xf32>
    %c16_i32 = arith.constant 16 : i32
    %71 = vector.broadcast %c16_i32 : i32 to vector<8x32xi32>
    %72 = arith.addi %71, %54 : vector<8x32xi32>
    %73 = arith.cmpi eq, %53, %72 : vector<8x32xi32>
    %74 = arith.extui %73 : vector<8x32xi1> to vector<8x32xi32>
    %75 = arith.sitofp %74 : vector<8x32xi32> to vector<8x32xf32>
    %76 = vector.extract_strided_slice %52 {offsets = [4, 0, 0], sizes = [2, 8, 8], strides = [1, 1, 1]} : vector<8x8x8xf32> to vector<2x8x8xf32>
    %77 = vector.shape_cast %76 : vector<2x8x8xf32> to vector<16x8xf32>
    %cst_17 = arith.constant dense<0.000000e+00> : vector<16x32xf32>
    %78 = tpu.matmul %77, %75, %cst_17 {dimension_numbers = #tpu.dot_dimension_numbers<[1], [0], [0], [1], [0, 0, 1, 1], [], []>} : vector<16x8xf32>, vector<8x32xf32>, vector<16x32xf32> -> vector<16x32xf32>
    %c24_i32 = arith.constant 24 : i32
    %79 = vector.broadcast %c24_i32 : i32 to vector<8x32xi32>
    %80 = arith.addi %79, %54 : vector<8x32xi32>
    %81 = arith.cmpi eq, %53, %80 : vector<8x32xi32>
    %82 = arith.extui %81 : vector<8x32xi1> to vector<8x32xi32>
    %83 = arith.sitofp %82 : vector<8x32xi32> to vector<8x32xf32>
    %84 = vector.extract_strided_slice %52 {offsets = [6, 0, 0], sizes = [2, 8, 8], strides = [1, 1, 1]} : vector<8x8x8xf32> to vector<2x8x8xf32>
    %85 = vector.shape_cast %84 : vector<2x8x8xf32> to vector<16x8xf32>
    %cst_18 = arith.constant dense<0.000000e+00> : vector<16x32xf32>
    %86 = tpu.matmul %85, %83, %cst_18 {dimension_numbers = #tpu.dot_dimension_numbers<[1], [0], [0], [1], [0, 0, 1, 1], [], []>} : vector<16x8xf32>, vector<8x32xf32>, vector<16x32xf32> -> vector<16x32xf32>
    %87 = arith.addf %62, %70 : vector<16x32xf32>
    %88 = arith.addf %78, %86 : vector<16x32xf32>
    %89 = arith.addf %87, %88 : vector<16x32xf32>
    %cst_19 = arith.constant dense<0.000000e+00> : vector<16xf32>
    %90 = vector.multi_reduction <add>, %89, %cst_19 [1] : vector<16x32xf32> to vector<16xf32>
    %91 = vector.shape_cast %90 : vector<16xf32> to vector<16x1xf32>
    %cst_20 = arith.constant 3.200000e+01 : f32
    %92 = vector.broadcast %cst_20 : f32 to vector<16x1xf32>
    %93 = arith.divf %91, %92 : vector<16x1xf32>
    %94 = vector.broadcast %93 : vector<16x1xf32> to vector<16x32xf32>
    %95 = arith.subf %89, %94 : vector<16x32xf32>
    %96 = arith.mulf %95, %95 : vector<16x32xf32>
    %cst_21 = arith.constant dense<0.000000e+00> : vector<16xf32>
    %97 = vector.multi_reduction <add>, %96, %cst_21 [1] : vector<16x32xf32> to vector<16xf32>
    %98 = vector.shape_cast %97 : vector<16xf32> to vector<16x1xf32>
    %cst_22 = arith.constant 3.200000e+01 : f32
    %99 = vector.broadcast %cst_22 : f32 to vector<16x1xf32>
    %100 = arith.divf %98, %99 : vector<16x1xf32>
    %cst_23 = arith.constant 9.99999974E-6 : f32
    %101 = vector.broadcast %cst_23 : f32 to vector<16x1xf32>
    %102 = arith.addf %100, %101 : vector<16x1xf32>
    %103 = math.rsqrt %102 : vector<16x1xf32>
    %104 = vector.broadcast %103 : vector<16x1xf32> to vector<16x32xf32>
    %105 = arith.mulf %95, %104 : vector<16x32xf32>
    %106 = vector.broadcast %3 : vector<1x32xf32> to vector<16x32xf32>
    %107 = arith.mulf %105, %106 : vector<16x32xf32>
    %108 = vector.broadcast %4 : vector<1x32xf32> to vector<16x32xf32>
    %109 = arith.addf %107, %108 : vector<16x32xf32>
    %c0_24 = arith.constant 0 : index
    %c0_25 = arith.constant 0 : index
    %110 = vector.load %arg3[%c0_24, %c0_25] : memref<32x32xf32, #tpu.memory_space<vmem>>, vector<32x32xf32>
    %cst_26 = arith.constant dense<0.000000e+00> : vector<16x32xf32>
    %111 = tpu.matmul %109, %110, %cst_26 {dimension_numbers = #tpu.dot_dimension_numbers<[1], [0], [0], [1], [0, 0, 1, 1], [], []>} : vector<16x32xf32>, vector<32x32xf32>, vector<16x32xf32> -> vector<16x32xf32>
    %112 = vector.broadcast %2 : vector<1x32xf32> to vector<16x32xf32>
    %113 = arith.addf %111, %112 : vector<16x32xf32>
    %cst_27 = arith.constant 0.000000e+00 : f32
    %114 = vector.broadcast %cst_27 : f32 to vector<16x32xf32>
    %115 = arith.maximumf %113, %114 : vector<16x32xf32>
    %116 = arith.addf %109, %115 : vector<16x32xf32>
    %cst_28 = arith.constant dense<0.000000e+00> : vector<16xf32>
    %117 = vector.multi_reduction <add>, %116, %cst_28 [1] : vector<16x32xf32> to vector<16xf32>
    %118 = vector.shape_cast %117 : vector<16xf32> to vector<16x1xf32>
    %cst_29 = arith.constant 3.200000e+01 : f32
    %119 = vector.broadcast %cst_29 : f32 to vector<16x1xf32>
    %120 = arith.divf %118, %119 : vector<16x1xf32>
    %121 = vector.broadcast %120 : vector<16x1xf32> to vector<16x32xf32>
    %122 = arith.subf %116, %121 : vector<16x32xf32>
    %123 = arith.mulf %122, %122 : vector<16x32xf32>
    %cst_30 = arith.constant dense<0.000000e+00> : vector<16xf32>
    %124 = vector.multi_reduction <add>, %123, %cst_30 [1] : vector<16x32xf32> to vector<16xf32>
    %125 = vector.shape_cast %124 : vector<16xf32> to vector<16x1xf32>
    %cst_31 = arith.constant 3.200000e+01 : f32
    %126 = vector.broadcast %cst_31 : f32 to vector<16x1xf32>
    %127 = arith.divf %125, %126 : vector<16x1xf32>
    %cst_32 = arith.constant 9.99999974E-6 : f32
    %128 = vector.broadcast %cst_32 : f32 to vector<16x1xf32>
    %129 = arith.addf %127, %128 : vector<16x1xf32>
    %130 = math.rsqrt %129 : vector<16x1xf32>
    %131 = vector.broadcast %130 : vector<16x1xf32> to vector<16x32xf32>
    %132 = arith.mulf %122, %131 : vector<16x32xf32>
    %133 = vector.broadcast %5 : vector<1x32xf32> to vector<16x32xf32>
    %134 = arith.mulf %132, %133 : vector<16x32xf32>
    %135 = vector.broadcast %6 : vector<1x32xf32> to vector<16x32xf32>
    %136 = arith.addf %134, %135 : vector<16x32xf32>
    %c0_33 = arith.constant 0 : index
    %c0_34 = arith.constant 0 : index
    %137 = vector.load %arg5[%c0_33, %c0_34] : memref<16x32xf32, #tpu.memory_space<vmem>>, vector<16x32xf32>
    tpu.vector_store %arg5[%c0_33, %c0_34], %136 {strides = array<i32>} : memref<16x32xf32, #tpu.memory_space<vmem>>, vector<16x32xf32>,
    return
  }
  func.func @transform_0(%arg0: i32) -> (i32, i32) {
    %c0_i32 = arith.constant 0 : i32
    %c0_i32_0 = arith.constant 0 : i32
    return %arg0, %c0_i32 : i32, i32
  }
  func.func @transform_1(%arg0: i32) -> (i32, i32) {
    %c0_i32 = arith.constant 0 : i32
    %c0_i32_0 = arith.constant 0 : i32
    %c0_i32_1 = arith.constant 0 : i32
    return %c0_i32, %c0_i32_0 : i32, i32
  }
  func.func @transform_2(%arg0: i32) -> (i32, i32) {
    %c0_i32 = arith.constant 0 : i32
    %c0_i32_0 = arith.constant 0 : i32
    %c0_i32_1 = arith.constant 0 : i32
    return %c0_i32, %c0_i32_0 : i32, i32
  }
  func.func @transform_3(%arg0: i32) -> (i32, i32) {
    %c0_i32 = arith.constant 0 : i32
    %c0_i32_0 = arith.constant 0 : i32
    %c0_i32_1 = arith.constant 0 : i32
    return %c0_i32, %c0_i32_0 : i32, i32
  }
  func.func @transform_4(%arg0: i32) -> (i32, i32) {
    %c0_i32 = arith.constant 0 : i32
    %c0_i32_0 = arith.constant 0 : i32
    return %arg0, %c0_i32 : i32, i32
  }
}

</mosaic_0001>

<bundles_post_ra>
// kernel: tpu_custom_call.1
= control target key start
LH: loop header
LB: loop body
LE: loop exit
PB: predicated region body
PF: predicated region fallthrough
CT: control target
= control target key end

     0   :  { %9 = vsyncpa [#allocation3], 0  ;;  %s1750_s0 = inlined_call_operand.hbm [shape: f32[16,16], index: 0, kind: input, shape index: {}]   ;;  %s1751_s1 = inlined_call_operand.hbm [shape: f32[16,32], index: 1, kind: input, shape index: {}]   ;;  %s1752_s2 = inlined_call_operand.hbm [shape: f32[32,32], index: 2, kind: input, shape index: {}]   ;;  %s1753_s3 = inlined_call_operand.hbm [shape: f32[6,32], index: 3, kind: input, shape index: {}]   ;;  %s1754_s4 = inlined_call_operand.hbm [shape: f32[16,32], index: 4, kind: output, shape index: {}]  }
   0x1   :  { %10 = vsyncpa [#allocation6], 0 }
   0x2   :  { %11 = vsyncpa [#allocation9], 0 }
   0x3   :  { %12 = vsyncpa [#allocation4], 0  ;;  %s30_s17 = sshll.u32 %s1751_s1, 4  ;;  %s1413_s18 = smov [#allocation5]   ;;  %s31_s17 = int_to_ptr.hbm [resolvable:$true] %s30_s17 }
   0x4   :  { %s32_s19 = sshll.u32 %s1413_s18, 4  ;;  %s17_s22 = sshll.u32 %s1750_s0, 4  ;;  %s33_s19 = int_to_ptr.vmem [resolvable:$true] %s32_s19  ;;  %s18_s22 = int_to_ptr.hbm [resolvable:$true] %s17_s22 }
   0x5   :  { %s1414_s23 = smov 128   ;;  %s1415_s24 = smov 8  }
   0x6   :  { %38 = dma.hbm_to_vmem [thread:$0]  %s31_s17, 256, %s33_s19, [#allocation6], %s1414_s23, %s1414_s23, %s1415_s24  }
   0x7   :  { %s1416_s25 = smov [#allocation2]   ;;  %s43_s1 = sshll.u32 %s1752_s2, 4  ;;  %s44_s1 = int_to_ptr.hbm [resolvable:$true] %s43_s1 }
   0x8   :  { %s19_s26 = sshll.u32 %s1416_s25, 4  ;;  %s57_s30 = sshll.u32 %s1753_s3, 4  ;;  %s20_s26 = int_to_ptr.vmem [resolvable:$true] %s19_s26  ;;  %s58_s30 = int_to_ptr.hbm [resolvable:$true] %s57_s30 }
   0x9   :  { %25 = dma.hbm_to_vmem [thread:$0]  %s18_s22, 256, %s20_s26, [#allocation3], %s1414_s23, %s1414_s23, %s1415_s24  }
   0xa   :  { %s1417_s5 = smov [#allocation7]   ;;  %s1418_s7 = smov [#allocation8]  }
   0xb   :  { %s45_s6 = sshll.u32 %s1417_s5, 4  ;;  %s59_s2 = sshll.u32 %s1418_s7, 4  ;;  %s46_s6 = int_to_ptr.vmem [resolvable:$true] %s45_s6  ;;  %s60_s2 = int_to_ptr.vmem [resolvable:$true] %s59_s2 }
   0xc   :  { %51 = dma.hbm_to_vmem [thread:$0]  %s44_s1, 512, %s46_s6, [#allocation6], %s1414_s23, %s1414_s23, %s1415_s24  }
   0xd   :  { %62 = dma.hbm_to_vmem [thread:$0]  %s58_s30, 128, %s60_s2, [#allocation9]  }
   0xe   :  { %1405 = dma.done.wait [#allocation3], 256  }
   0xf   :  { %1406 = vsyncadd [#allocation3], 4294967040 }
  0x10   :  { %1407 = dma.done.wait [#allocation6], 768  }
  0x11   :  { %1408 = vsyncadd [#allocation6], 4294966528 }
  0x12   :  { %1409 = dma.done.wait [#allocation9], 128  }
  0x13   :  { %1410 = vsyncadd [#allocation9], 4294967168  ;;  %v83_v0 = vld [vmem:[#allocation5 + $0x8] sm:$0xff]  ;;  %v82_v1 = vld [vmem:[#allocation5] sm:$0xff]  ;;  %vm85_vm0 = vcmask 130048   ;;  %vm135_vm1 = vcmask 64512  }
  0x14   :  { %106 = vmatpush.msra.mxu0 %v83_v0  ;;  %v80_v2 = vld [vmem:[#allocation2] sm:$0xff]  ;;  %v81_v3 = vld [vmem:[#allocation2 + $0x8] sm:$0xff]  ;;  %s1419_s3 = smov 120   ;;  %s1420_s8 = smov 112   ;;  %vm969_vm6 = vcmask 261120  }
  0x15   :  { %v79_v4 = vld [vmem:[#allocation8] sm:$0x3f]  ;;  %s1421_s9 = smov 104   ;;  %s1424_s10 = smov [#allocation10]  }
  0x16   :  { %107 = vmatpush.msra.mxu0 %v82_v1  ;;  %v84_v5 = vperm.slane %v79_v4, 0  ;;  %s1121_s11 = sshll.u32 %s1424_s10, 4  ;;  %s1123_s14 = sshll.u32 %s1754_s4, 4  ;;  %s1122_s11 = int_to_ptr.vmem [resolvable:$true] %s1121_s11  ;;  %s1124_s14 = int_to_ptr.hbm [resolvable:$true] %s1123_s14 }
  0x17   :  { %1138 = vmatmul.msk.f32.vlgmr.msra.gmra.mxu0 %vm85_vm0, %v80_v2 }
  0x1f   :  { %1139 = vmatmul.msk.f32.gmra.mxu0 %vm85_vm0, %v81_v3 }
  0x94   :  { %v109_v6 = vpop.f32.mrf.mxu0 }
  0x95   :  { %v1471_v7 = vadd.f32 %v109_v6, %v84_v5 }
  0x97   :  { %117 = vrot.lane.b32.xlu0 %v1471_v7, %s1419_s3  ;;  %1140 = vmatpush.xpose.msk.msra.mxu1 %vm135_vm1, %v1471_v7 }
  0x9a   :  { %1141 = vmatmul.msk.f32.vlgmr.msra.gmra.mxu1 %vm135_vm1, %v1471_v7 }
  0x9c   :  { %v112_v8 = vpop.f32.mrf.mxu0 }
  0x9d   :  { %v1478_v9 = vadd.f32 %v112_v8, %v84_v5 }
  0x9f   :  { %125 = vrot.lane.b32.xlu2 %v1478_v9, %s1420_s8  ;;  %119 = vrot.lane.b32.xlu1 %v1478_v9, %s1419_s3 }
  0xa0   :  { %1142 = vmatpush.xpose.msk.msra.mxu3 %vm135_vm1, %v1478_v9  ;;  %123 = vrot.lane.b32.xlu0 %v1471_v7, %s1420_s8 }
  0xa3   :  { %1143 = vmatmul.msk.f32.vlgmr.msra.gmra.mxu3 %vm135_vm1, %v1478_v9 }
  0xa7   :  { %131 = vrot.lane.b32.xlu2 %v1478_v9, %s1421_s9  ;;  %129 = vrot.lane.b32.xlu1 %v1471_v7, %s1421_s9 }
  0xf9   :  { %v1489_v10 = vpop.permute.xlu2 %125 }
 0x101   :  { %v1502_v13 = vpop.permute.xlu2 %131 }
 0x109   :  { %v1491_v11 = vpop.permute.xlu0 %117 }
 0x10a   :  { %1144 = vmatpush.xpose.msk.msrb.mxu3 %vm135_vm1, %v1491_v11 }
 0x10d   :  { %1145 = vmatmul.msk.f32.vlgmr.msrb.gmra.mxu3 %vm135_vm1, %v1491_v11 }
 0x10e   :  { %1150 = vmatpush.xpose.msk.msra.mxu3 %vm135_vm1, %v1489_v10 }
 0x111   :  { %v1500_v12 = vpop.permute.xlu1 %119 }
 0x112   :  { %681 = vmatpush.msrb.mxu3 %v1478_v9  ;;  %v1504_v14 = vpop.permute.xlu0 %123  ;;  %1146 = vmatpush.xpose.msk.msrb.mxu1 %vm135_vm1, %v1500_v12 }
 0x113   :  { %1148 = vmatpush.xpose.msk.msra.mxu2 %vm135_vm1, %v1504_v14 }
 0x115   :  { %1147 = vmatmul.msk.f32.vlgmr.msrb.gmra.mxu1 %vm135_vm1, %v1500_v12  ;;  %1151 = vmatmul.msk.f32.vlgmr.msra.gmra.mxu3 %vm135_vm1, %v1489_v10 }
 0x116   :  { %1154 = vmatpush.xpose.msk.msra.mxu1 %vm135_vm1, %v1502_v13  ;;  %1149 = vmatmul.msk.f32.vlgmr.msra.gmra.mxu2 %vm135_vm1, %v1504_v14 }
 0x117   :  { %658 = vmatpush.msrb.mxu2 %v1471_v7  ;;  %773 = vmatpush.msra.mxu3 %v1489_v10  ;;  %v155_v15 = vpop.f32.mrf.mxu1 }
 0x118   :  { %v1522_v16 = vmul.f32 0.17677669, %v155_v15 }
 0x119   :  { %750 = vmatpush.msra.mxu2 %v1504_v14  ;;  %v1524_v17 = vpop.permute.xlu1 %129 }
 0x11a   :  { %727 = vmatpush.msrb.mxu1 %v1500_v12  ;;  %1152 = vmatpush.xpose.msk.msrb.mxu0 %vm135_vm1, %v1524_v17  ;;  %v320_v18 = vsel %vm135_vm1, %v1522_v16, -inf }
 0x11b   :  { %321 = vmax.xlane.f32.xlu0 %v320_v18 }
 0x11d   :  { %1153 = vmatmul.msk.f32.vlgmr.msrb.gmra.mxu0 %vm135_vm1, %v1524_v17  ;;  %1155 = vmatmul.msk.f32.vlgmr.msra.gmra.mxu1 %vm135_vm1, %v1502_v13 }
 0x11e   :  { %704 = vmatpush.msra.mxu0 %v1491_v11  ;;  %819 = vmatpush.msra.mxu1 %v1502_v13 }
 0x120   :  { %796 = vmatpush.msrb.mxu0 %v1524_v17 }
 0x126   :  { %v177_v19 = vpop.f32.mrf.mxu3 }
 0x127   :  { %v1537_v20 = vmul.f32 0.17677669, %v177_v19 }
 0x129   :  { %v323_v21 = vsel %vm135_vm1, %v1537_v20, -inf }
 0x12a   :  { %324 = vmax.xlane.f32.xlu2 %v323_v21 }
 0x18e   :  { %v1541_v23 = vpop.xlane.xlu0 %321 }
 0x18f   :  { %v344_v28 = vsub.f32 %v1522_v16, %v1541_v23 }
 0x190   :  { %v199_v22 = vpop.f32.mrf.mxu3 }
 0x191   :  { %v1543_v24 = vmul.f32 0.17677669, %v199_v22  ;;  %v352_v30 = vmul.f32 1.442695, %v344_v28 }
 0x192   :  { %v221_v25 = vpop.f32.mrf.mxu1 }
 0x193   :  { %v1545_v26 = vmul.f32 0.17677669, %v221_v25  ;;  %v326_v27 = vsel %vm135_vm1, %v1543_v24, -inf  ;;  %1194 = vpow2.f32 %v352_v30 }
 0x194   :  { %327 = vmax.xlane.f32.xlu1 %v326_v27 }
 0x195   :  { %v329_v29 = vsel %vm135_vm1, %v1545_v26, -inf }
 0x196   :  { %330 = vmax.xlane.f32.xlu2 %v329_v29 }
 0x198   :  { %v265_v31 = vpop.f32.mrf.mxu3 }
 0x199   :  { %v243_v32 = vpop.f32.mrf.mxu2  ;;  %v1553_v33 = vmul.f32 0.17677669, %v265_v31  ;;  %v1195_v45 = vpop.eup %1194 }
 0x19a   :  { %v1555_v34 = vmul.f32 0.17677669, %v243_v32  ;;  %v287_v35 = vpop.f32.mrf.mxu0  ;;  %v309_v38 = vpop.f32.mrf.mxu1  ;;  %v368_v47 = vsel %vm135_vm1, %v1195_v45, 0.0 }
 0x19b   :  { %v1557_v36 = vmul.f32 0.17677669, %v287_v35  ;;  %v335_v41 = vsel %vm135_vm1, %v1553_v33, -inf  ;;  %v1569_v43 = vmul.f32 0.17677669, %v309_v38 }
 0x19c   :  { %v332_v37 = vsel %vm135_vm1, %v1555_v34, -inf }
 0x19d   :  { %v1561_v39 = vpop.xlane.xlu2 %324  ;;  %333 = vmax.xlane.f32.xlu0 %v332_v37  ;;  %v338_v40 = vsel %vm135_vm1, %v1557_v36, -inf  ;;  %v341_v46 = vsel %vm135_vm1, %v1569_v43, -inf }
 0x19e   :  { %v345_v42 = vsub.f32 %v1537_v20, %v1561_v39  ;;  %339 = vmax.xlane.f32.xlu1 %v338_v40  ;;  %336 = vmax.xlane.f32.xlu2 %v335_v41 }
 0x1a0   :  { %v354_v44 = vmul.f32 1.442695, %v345_v42 }
 0x1a2   :  { %1196 = vpow2.f32 %v354_v44 }
 0x1a5   :  { %342 = vmax.xlane.f32.xlu0 %v341_v46 }
 0x1a6   :  { %369 = vadd.xlane.f32.xlu1 %v368_v47 }
 0x1a8   :  { %v1197_v48 = vpop.eup %1196 }
 0x1a9   :  { %v371_v49 = vsel %vm135_vm1, %v1197_v48, 0.0 }
 0x1ad   :  { %372 = vadd.xlane.f32.xlu0 %v371_v49 }
 0x207   :  { %v1575_v50 = vpop.xlane.xlu1 %327 }
 0x208   :  { %v346_v51 = vsub.f32 %v1543_v24, %v1575_v50 }
 0x209   :  { %v1579_v52 = vpop.xlane.xlu2 %330 }
 0x20a   :  { %v356_v53 = vmul.f32 1.442695, %v346_v51  ;;  %v347_v54 = vsub.f32 %v1545_v26, %v1579_v52 }
 0x20c   :  { %1198 = vpow2.f32 %v356_v53  ;;  %v358_v55 = vmul.f32 1.442695, %v347_v54 }
 0x20e   :  { %1200 = vpow2.f32 %v358_v55 }
 0x210   :  { %v1583_v56 = vpop.xlane.xlu0 %333 }
 0x211   :  { %v348_v57 = vsub.f32 %v1555_v34, %v1583_v56  ;;  %v1587_v58 = vpop.xlane.xlu1 %339  ;;  %v1589_v59 = vpop.xlane.xlu2 %336 }
 0x212   :  { %v1199_v60 = vpop.eup %1198  ;;  %v350_v61 = vsub.f32 %v1557_v36, %v1587_v58  ;;  %v349_v62 = vsub.f32 %v1553_v33, %v1589_v59 }
 0x213   :  { %v360_v63 = vmul.f32 1.442695, %v348_v57  ;;  %v374_v0 = vsel %vm135_vm1, %v1199_v60, 0.0 }
 0x214   :  { %v1201_v1 = vpop.eup %1200  ;;  %v364_v2 = vmul.f32 1.442695, %v350_v61  ;;  %v362_v3 = vmul.f32 1.442695, %v349_v62  ;;  %375 = vadd.xlane.f32.xlu2 %v374_v0 }
 0x215   :  { %1202 = vpow2.f32 %v360_v63  ;;  %v377_v4 = vsel %vm135_vm1, %v1201_v1, 0.0 }
 0x216   :  { %1204 = vpow2.f32 %v364_v2  ;;  %378 = vadd.xlane.f32.xlu1 %v377_v4 }
 0x217   :  { %1206 = vpow2.f32 %v362_v3 }
 0x218   :  { %v1597_v5 = vpop.xlane.xlu0 %342 }
 0x219   :  { %v351_v6 = vsub.f32 %v1569_v43, %v1597_v5  ;;  %v370_v8 = vpop.xlane.xlu1 %369 }
 0x21a   :  { %1208 = vlog2.f32 %v370_v8 }
 0x21b   :  { %v1203_v15 = vpop.eup %1202  ;;  %v366_v18 = vmul.f32 1.442695, %v351_v6 }
 0x21c   :  { %v1205_v19 = vpop.eup %1204  ;;  %v380_v21 = vsel %vm135_vm1, %v1203_v15, 0.0 }
 0x21d   :  { %v1207_v22 = vpop.eup %1206  ;;  %1210 = vpow2.f32 %v366_v18  ;;  %381 = vadd.xlane.f32.xlu2 %v380_v21  ;;  %v386_v25 = vsel %vm135_vm1, %v1205_v19, 0.0 }
 0x21e   :  { %v383_v27 = vsel %vm135_vm1, %v1207_v22, 0.0  ;;  %387 = vadd.xlane.f32.xlu0 %v386_v25 }
 0x21f   :  { %384 = vadd.xlane.f32.xlu1 %v383_v27 }
 0x220   :  { %v1209_v28 = vpop.eup %1208  ;;  %v373_v29 = vpop.xlane.xlu0 %372 }
 0x221   :  { %v393_v30 = vmul.f32 0.6931472, %v1209_v28  ;;  %1212 = vlog2.f32 %v373_v29 }
 0x223   :  { %v1211_v31 = vpop.eup %1210  ;;  %v408_v32 = vadd.f32 %v393_v30, %v1541_v23 }
 0x224   :  { %v389_v35 = vsel %vm135_vm1, %v1211_v31, 0.0 }
 0x225   :  { %v416_v37 = vsub.f32 -2.0794415, %v408_v32  ;;  %390 = vadd.xlane.f32.xlu2 %v389_v35 }
 0x227   :  { %v1213_v38 = vpop.eup %1212  ;;  %v424_v40 = vadd.f32 %v416_v37, %v1522_v16 }
 0x228   :  { %v395_v41 = vmul.f32 0.6931472, %v1213_v38 }
 0x229   :  { %v432_v42 = vsel %vm135_vm1, %v424_v40, -inf }
 0x22a   :  { %v433_v44 = vrot.slane %v432_v42, 4  ;;  %v409_v45 = vadd.f32 %v395_v41, %v1561_v39 }
 0x22c   :  { %v434_v46 = vmax.f32 %v432_v42, %v433_v44  ;;  %v417_v47 = vsub.f32 -2.0794415, %v409_v45 }
 0x22e   :  { %v435_v48 = vrot.slane %v434_v46, 2  ;;  %v425_v49 = vadd.f32 %v417_v47, %v1537_v20 }
 0x230   :  { %v436_v51 = vmax.f32 %v434_v46, %v435_v48  ;;  %v439_v23 = vsel %vm135_vm1, %v425_v49, -inf }
 0x231   :  { %v440_v53 = vrot.slane %v439_v23, 4 }
 0x232   :  { %v437_v54 = vrot.slane %v436_v51, 1 }
 0x233   :  { %v441_v55 = vmax.f32 %v439_v23, %v440_v53 }
 0x234   :  { %v438_v57 = vmax.f32 %v436_v51, %v437_v54 }
 0x235   :  { %v442_v60 = vrot.slane %v441_v55, 2 }
 0x236   :  { %v488_v16 = vsub.f32 %v424_v40, %v438_v57 }
 0x237   :  { %v443_v61 = vmax.f32 %v441_v55, %v442_v60 }
 0x238   :  { %v496_v62 = vmul.f32 1.442695, %v488_v16 }
 0x239   :  { %v444_v63 = vrot.slane %v443_v61, 1 }
 0x23a   :  { %1214 = vpow2.f32 %v496_v62 }
 0x23b   :  { %v445_v0 = vmax.f32 %v443_v61, %v444_v63 }
 0x23d   :  { %v489_v39 = vsub.f32 %v425_v49, %v445_v0 }
 0x23f   :  { %v498_v1 = vmul.f32 1.442695, %v489_v39 }
 0x240   :  { %v1215_v2 = vpop.eup %1214 }
 0x241   :  { %v512_v3 = vsel %vm135_vm1, %v1215_v2, 0.0  ;;  %1216 = vpow2.f32 %v498_v1 }
 0x242   :  { %v513_v20 = vrot.slane %v512_v3, 4 }
 0x244   :  { %v514_v4 = vadd.f32 %v513_v20, %v512_v3 }
 0x246   :  { %v515_v6 = vrot.slane %v514_v4, 2 }
 0x247   :  { %v1217_v8 = vpop.eup %1216 }
 0x248   :  { %v516_v15 = vadd.f32 %v515_v6, %v514_v4  ;;  %v519_v18 = vsel %vm135_vm1, %v1217_v8, 0.0 }
 0x249   :  { %v520_v19 = vrot.slane %v519_v18, 4 }
 0x24a   :  { %v517_v21 = vrot.slane %v516_v15, 1 }
 0x24b   :  { %v521_v22 = vadd.f32 %v520_v19, %v519_v18 }
 0x24c   :  { %v518_v25 = vadd.f32 %v517_v21, %v516_v15 }
 0x24d   :  { %v522_v27 = vrot.slane %v521_v22, 2 }
 0x24e   :  { %1218 = vlog2.f32 %v518_v25 }
 0x24f   :  { %v523_v28 = vadd.f32 %v522_v27, %v521_v22 }
 0x251   :  { %v524_v29 = vrot.slane %v523_v28, 1 }
 0x253   :  { %v525_v30 = vadd.f32 %v524_v29, %v523_v28 }
 0x254   :  { %v1219_v31 = vpop.eup %1218 }
 0x255   :  { %1220 = vlog2.f32 %v525_v30  ;;  %v569_v32 = vmul.f32 0.6931472, %v1219_v31 }
 0x257   :  { %v584_v35 = vadd.f32 %v569_v32, %v438_v57 }
 0x259   :  { %v592_v37 = vsub.f32 -2.0794415, %v584_v35 }
 0x25b   :  { %v1221_v38 = vpop.eup %1220  ;;  %v600_v40 = vadd.f32 %v592_v37, %v438_v57 }
 0x25c   :  { %v571_v41 = vmul.f32 0.6931472, %v1221_v38 }
 0x25d   :  { %v608_v42 = vmul.f32 1.442695, %v600_v40 }
 0x25e   :  { %v585_v44 = vadd.f32 %v571_v41, %v445_v0 }
 0x25f   :  { %1222 = vpow2.f32 %v608_v42 }
 0x260   :  { %v593_v45 = vsub.f32 -2.0794415, %v585_v44 }
 0x262   :  { %v601_v46 = vadd.f32 %v593_v45, %v445_v0 }
 0x264   :  { %v610_v47 = vmul.f32 1.442695, %v601_v46 }
 0x265   :  { %v1223_v48 = vpop.eup %1222 }
 0x266   :  { %v624_v49 = vmul.f32 8.0, %v1223_v48  ;;  %1224 = vpow2.f32 %v610_v47 }
 0x268   :  { %v632_v51 = vmul.f32 %v1215_v2, %v624_v49 }
 0x26a   :  { %1156 = vmatmul.msk.f32.vlgmr.msrb.gmra.mxu2 %vm135_vm1, %v632_v51 }
 0x26c   :  { %v1225_v23 = vpop.eup %1224 }
 0x26d   :  { %v625_v53 = vmul.f32 8.0, %v1225_v23 }
 0x26f   :  { %v633_v54 = vmul.f32 %v1217_v8, %v625_v53 }
 0x271   :  { %1157 = vmatmul.msk.f32.vlgmr.msrb.gmra.mxu3 %vm135_vm1, %v633_v54 }
 0x287   :  { %v376_v55 = vpop.xlane.xlu2 %375 }
 0x288   :  { %1226 = vlog2.f32 %v376_v55 }
 0x289   :  { %v379_v57 = vpop.xlane.xlu1 %378 }
 0x28a   :  { %1228 = vlog2.f32 %v379_v57 }
 0x28e   :  { %v1227_v60 = vpop.eup %1226 }
 0x28f   :  { %v397_v16 = vmul.f32 0.6931472, %v1227_v60 }
 0x290   :  { %v1229_v61 = vpop.eup %1228  ;;  %v382_v62 = vpop.xlane.xlu2 %381 }
 0x291   :  { %v410_v63 = vadd.f32 %v397_v16, %v1575_v50  ;;  %v399_v0 = vmul.f32 0.6931472, %v1229_v61  ;;  %1230 = vlog2.f32 %v382_v62  ;;  %v388_v39 = vpop.xlane.xlu0 %387 }
 0x292   :  { %v385_v1 = vpop.xlane.xlu1 %384  ;;  %1232 = vlog2.f32 %v388_v39 }
 0x293   :  { %v418_v2 = vsub.f32 -2.0794415, %v410_v63  ;;  %v411_v3 = vadd.f32 %v399_v0, %v1579_v52  ;;  %1234 = vlog2.f32 %v385_v1 }
 0x295   :  { %v426_v20 = vadd.f32 %v418_v2, %v1543_v24  ;;  %v419_v4 = vsub.f32 -2.0794415, %v411_v3 }
 0x297   :  { %v1231_v6 = vpop.eup %1230  ;;  %v446_v8 = vsel %vm135_vm1, %v426_v20, -inf  ;;  %v427_v15 = vadd.f32 %v419_v4, %v1545_v26 }
 0x298   :  { %v1233_v18 = vpop.eup %1232  ;;  %v447_v19 = vrot.slane %v446_v8, 4  ;;  %v401_v50 = vmul.f32 0.6931472, %v1231_v6  ;;  %v391_v21 = vpop.xlane.xlu2 %390 }
 0x299   :  { %v1235_v22 = vpop.eup %1234  ;;  %v453_v25 = vsel %vm135_vm1, %v427_v15, -inf  ;;  %v405_v27 = vmul.f32 0.6931472, %v1233_v18  ;;  %1236 = vlog2.f32 %v391_v21 }
 0x29a   :  { %v448_v28 = vmax.f32 %v446_v8, %v447_v19  ;;  %v454_v52 = vrot.slane %v453_v25, 4  ;;  %v412_v29 = vadd.f32 %v401_v50, %v1583_v56  ;;  %v403_v24 = vmul.f32 0.6931472, %v1235_v22 }
 0x29b   :  { %v414_v30 = vadd.f32 %v405_v27, %v1587_v58 }
 0x29c   :  { %v449_v31 = vrot.slane %v448_v28, 2  ;;  %v455_v32 = vmax.f32 %v453_v25, %v454_v52  ;;  %v420_v35 = vsub.f32 -2.0794415, %v412_v29  ;;  %v413_v26 = vadd.f32 %v403_v24, %v1589_v59 }
 0x29d   :  { %v422_v37 = vsub.f32 -2.0794415, %v414_v30 }
 0x29e   :  { %v450_v38 = vmax.f32 %v448_v28, %v449_v31  ;;  %v456_v40 = vrot.slane %v455_v32, 2  ;;  %v428_v41 = vadd.f32 %v420_v35, %v1555_v34  ;;  %v421_v42 = vsub.f32 -2.0794415, %v413_v26 }
 0x29f   :  { %v1237_v44 = vpop.eup %1236  ;;  %v430_v45 = vadd.f32 %v422_v37, %v1557_v36 }
 0x2a0   :  { %v451_v46 = vrot.slane %v450_v38, 1  ;;  %v457_v47 = vmax.f32 %v455_v32, %v456_v40  ;;  %v460_v56 = vsel %vm135_vm1, %v428_v41, -inf  ;;  %v429_v58 = vadd.f32 %v421_v42, %v1553_v33 }
 0x2a1   :  { %v461_v48 = vrot.slane %v460_v56, 4  ;;  %v474_v49 = vsel %vm135_vm1, %v430_v45, -inf  ;;  %v407_v51 = vmul.f32 0.6931472, %v1237_v44 }
 0x2a2   :  { %v1629_v59 = vmax.f32 %v450_v38, %v451_v46  ;;  %v458_v23 = vrot.slane %v457_v47, 1  ;;  %v467_v53 = vsel %vm135_vm1, %v429_v58, -inf  ;;  %v475_v34 = vrot.slane %v474_v49, 4 }
 0x2a3   :  { %v462_v54 = vmax.f32 %v460_v56, %v461_v48  ;;  %v468_v55 = vrot.slane %v467_v53, 4  ;;  %v415_v36 = vadd.f32 %v407_v51, %v1597_v5 }
 0x2a4   :  { %v490_v57 = vsub.f32 %v426_v20, %v1629_v59  ;;  %v1634_v60 = vmax.f32 %v457_v47, %v458_v23  ;;  %v476_v16 = vmax.f32 %v474_v49, %v475_v34 }
 0x2a5   :  { %v463_v33 = vrot.slane %v462_v54, 2  ;;  %v469_v61 = vmax.f32 %v467_v53, %v468_v55  ;;  %v423_v62 = vsub.f32 -2.0794415, %v415_v36 }
 0x2a6   :  { %v500_v63 = vmul.f32 1.442695, %v490_v57  ;;  %v491_v0 = vsub.f32 %v427_v15, %v1634_v60  ;;  %v477_v39 = vrot.slane %v476_v16, 2 }
 0x2a7   :  { %v464_v1 = vmax.f32 %v462_v54, %v463_v33  ;;  %v470_v2 = vrot.slane %v469_v61, 2  ;;  %v431_v3 = vadd.f32 %v423_v62, %v1569_v43 }
 0x2a8   :  { %1238 = vpow2.f32 %v500_v63  ;;  %v502_v4 = vmul.f32 1.442695, %v491_v0  ;;  %v478_v6 = vmax.f32 %v476_v16, %v477_v39 }
 0x2a9   :  { %v465_v5 = vrot.slane %v464_v1, 1  ;;  %v471_v8 = vmax.f32 %v469_v61, %v470_v2  ;;  %v481_v20 = vsel %vm135_vm1, %v431_v3, -inf }
 0x2aa   :  { %1240 = vpow2.f32 %v502_v4  ;;  %v479_v18 = vrot.slane %v478_v6, 1  ;;  %v482_v19 = vrot.slane %v481_v20, 4 }
 0x2ab   :  { %v1639_v50 = vmax.f32 %v464_v1, %v465_v5  ;;  %v472_v21 = vrot.slane %v471_v8, 1 }
 0x2ac   :  { %v1641_v22 = vmax.f32 %v478_v6, %v479_v18  ;;  %v483_v15 = vmax.f32 %v481_v20, %v482_v19 }
 0x2ad   :  { %v492_v25 = vsub.f32 %v428_v41, %v1639_v50  ;;  %v1644_v27 = vmax.f32 %v471_v8, %v472_v21 }
 0x2ae   :  { %v1646_v43 = vpop.eup %1238  ;;  %v494_v28 = vsub.f32 %v430_v45, %v1641_v22  ;;  %v484_v52 = vrot.slane %v483_v15, 2 }
 0x2af   :  { %v526_v29 = vsel %vm135_vm1, %v1646_v43, 0.0  ;;  %v504_v24 = vmul.f32 1.442695, %v492_v25  ;;  %v493_v30 = vsub.f32 %v429_v58, %v1644_v27 }
 0x2b0   :  { %v1652_v31 = vpop.eup %1240  ;;  %v527_v32 = vrot.slane %v526_v29, 4  ;;  %v508_v35 = vmul.f32 1.442695, %v494_v28  ;;  %v485_v26 = vmax.f32 %v483_v15, %v484_v52 }
 0x2b1   :  { %v533_v37 = vsel %vm135_vm1, %v1652_v31, 0.0  ;;  %1242 = vpow2.f32 %v504_v24  ;;  %v506_v38 = vmul.f32 1.442695, %v493_v30 }
 0x2b2   :  { %v528_v40 = vadd.f32 %v527_v32, %v526_v29  ;;  %v534_v41 = vrot.slane %v533_v37, 4  ;;  %1244 = vpow2.f32 %v508_v35  ;;  %v486_v42 = vrot.slane %v485_v26, 1 }
 0x2b3   :  { %1246 = vpow2.f32 %v506_v38 }
 0x2b4   :  { %v529_v44 = vrot.slane %v528_v40, 2  ;;  %v535_v45 = vadd.f32 %v534_v41, %v533_v37  ;;  %v1656_v46 = vmax.f32 %v485_v26, %v486_v42 }
 0x2b6   :  { %v530_v47 = vadd.f32 %v529_v44, %v528_v40  ;;  %v536_v56 = vrot.slane %v535_v45, 2  ;;  %v495_v58 = vsub.f32 %v431_v3, %v1656_v46 }
 0x2b7   :  { %v1659_v48 = vpop.eup %1242 }
 0x2b8   :  { %v1661_v49 = vpop.eup %1244  ;;  %v531_v51 = vrot.slane %v530_v47, 1  ;;  %v537_v23 = vadd.f32 %v536_v56, %v535_v45  ;;  %v540_v53 = vsel %vm135_vm1, %v1659_v48, 0.0  ;;  %v510_v34 = vmul.f32 1.442695, %v495_v58 }
 0x2b9   :  { %v1665_v54 = vpop.eup %1246  ;;  %v541_v55 = vrot.slane %v540_v53, 4  ;;  %v554_v36 = vsel %vm135_vm1, %v1661_v49, 0.0 }
 0x2ba   :  { %v532_v57 = vadd.f32 %v531_v51, %v530_v47  ;;  %v538_v16 = vrot.slane %v537_v23, 1  ;;  %v547_v33 = vsel %vm135_vm1, %v1665_v54, 0.0  ;;  %v555_v61 = vrot.slane %v554_v36, 4 }
 0x2bb   :  { %v542_v62 = vadd.f32 %v541_v55, %v540_v53  ;;  %v548_v63 = vrot.slane %v547_v33, 4  ;;  %1248 = vpow2.f32 %v510_v34 }
 0x2bc   :  { %1250 = vlog2.f32 %v532_v57  ;;  %v539_v0 = vadd.f32 %v538_v16, %v537_v23  ;;  %v556_v39 = vadd.f32 %v555_v61, %v554_v36  ;;  %v832_v61 = vlaneseq }
 0x2bd   :  { %v543_v1 = vrot.slane %v542_v62, 2  ;;  %v549_v2 = vadd.f32 %v548_v63, %v547_v33 }
 0x2be   :  { %1252 = vlog2.f32 %v539_v0  ;;  %v557_v3 = vrot.slane %v556_v39, 2  ;;  %v833_v0 = vand.u32 127, %v832_v61 }
 0x2bf   :  { %v544_v4 = vadd.f32 %v543_v1, %v542_v62  ;;  %v550_v6 = vrot.slane %v549_v2, 2 }
 0x2c0   :  { %v558_v5 = vadd.f32 %v557_v3, %v556_v39  ;;  %v835_v39 = vshrl.u32 %v832_v61, 7 }
 0x2c1   :  { %v1671_v8 = vpop.eup %1248  ;;  %v545_v20 = vrot.slane %v544_v4, 1  ;;  %v551_v18 = vadd.f32 %v550_v6, %v549_v2 }
 0x2c2   :  { %v1251_v19 = vpop.eup %1250  ;;  %v559_v21 = vrot.slane %v558_v5, 1  ;;  %v561_v15 = vsel %vm135_vm1, %v1671_v8, 0.0  ;;  %vm836_vm2 = vcmp.eq.s32.totalorder %v833_v0, %v835_v39 }
 0x2c3   :  { %v573_v25 = vmul.f32 0.6931472, %v1251_v19  ;;  %v546_v28 = vadd.f32 %v545_v20, %v544_v4  ;;  %v552_v52 = vrot.slane %v551_v18, 1  ;;  %v562_v29 = vrot.slane %v561_v15, 4 }
 0x2c4   :  { %v1253_v24 = vpop.eup %1252  ;;  %v560_v30 = vadd.f32 %v559_v21, %v558_v5 }
 0x2c5   :  { %v586_v32 = vadd.f32 %v573_v25, %v1629_v59  ;;  %v575_v35 = vmul.f32 0.6931472, %v1253_v24  ;;  %1254 = vlog2.f32 %v546_v28  ;;  %v553_v26 = vadd.f32 %v552_v52, %v551_v18 }
 0x2c6   :  { %1256 = vlog2.f32 %v560_v30  ;;  %v563_v37 = vadd.f32 %v562_v29, %v561_v15  ;;  %v1422_v29 = vmov 1.0  }
 0x2c7   :  { %v594_v38 = vsub.f32 -2.0794415, %v586_v32  ;;  %v587_v40 = vadd.f32 %v575_v35, %v1634_v60  ;;  %1258 = vlog2.f32 %v553_v26 }
 0x2c8   :  { %v564_v41 = vrot.slane %v563_v37, 2 }
 0x2c9   :  { %v595_v42 = vsub.f32 -2.0794415, %v587_v40  ;;  %v602_v44 = vadd.f32 %v594_v38, %v1629_v59 }
 0x2ca   :  { %v565_v45 = vadd.f32 %v564_v41, %v563_v37 }
 0x2cb   :  { %v1255_v47 = vpop.eup %1254  ;;  %v612_v56 = vmul.f32 1.442695, %v602_v44  ;;  %v603_v58 = vadd.f32 %v595_v42, %v1634_v60 }
 0x2cc   :  { %v1257_v51 = vpop.eup %1256  ;;  %v577_v23 = vmul.f32 0.6931472, %v1255_v47  ;;  %v566_v53 = vrot.slane %v565_v45, 1 }
 0x2cd   :  { %v1259_v34 = vpop.eup %1258  ;;  %v581_v55 = vmul.f32 0.6931472, %v1257_v51  ;;  %1260 = vpow2.f32 %v612_v56  ;;  %v614_v36 = vmul.f32 1.442695, %v603_v58  ;;  %v876_v56 = vadd.s32 24, %v835_v39 }
 0x2ce   :  { %v588_v57 = vadd.f32 %v577_v23, %v1639_v50  ;;  %v579_v16 = vmul.f32 0.6931472, %v1259_v34  ;;  %v567_v33 = vadd.f32 %v566_v53, %v565_v45  ;;  %v872_v58 = vadd.s32 16, %v835_v39 }
 0x2cf   :  { %v590_v62 = vadd.f32 %v581_v55, %v1641_v22  ;;  %1262 = vpow2.f32 %v614_v36  ;;  %vm877_vm4 = vcmp.eq.s32.totalorder %v833_v0, %v876_v56  ;;  %v1725_v56 = vld [vmem:[#allocation8] sm:$0x3f] }
 0x2d0   :  { %v596_v59 = vsub.f32 -2.0794415, %v588_v57  ;;  %v589_v63 = vadd.f32 %v579_v16, %v1644_v27  ;;  %1264 = vlog2.f32 %v567_v33  ;;  %1171 = vmatpush.msk.msrb.mxu3 %vm877_vm4, %v1422_v29  ;;  %vm873_vm5 = vcmp.eq.s32.totalorder %v833_v0, %v872_v58 }
 0x2d1   :  { %v598_v60 = vsub.f32 -2.0794415, %v590_v62  ;;  %v1021_v58 = vperm.slane %v1725_v56, 2 }
 0x2d2   :  { %v597_v1 = vsub.f32 -2.0794415, %v589_v63  ;;  %v604_v2 = vadd.f32 %v596_v59, %v1639_v50 }
 0x2d3   :  { %v1261_v3 = vpop.eup %1260  ;;  %v606_v4 = vadd.f32 %v598_v60, %v1641_v22 }
 0x2d4   :  { %v626_v6 = vmul.f32 8.0, %v1261_v3  ;;  %v616_v5 = vmul.f32 1.442695, %v604_v2  ;;  %v605_v20 = vadd.f32 %v597_v1, %v1644_v27 }
 0x2d5   :  { %v1263_v18 = vpop.eup %1262  ;;  %v620_v19 = vmul.f32 1.442695, %v606_v4  ;;  %v1423_v4 = vmov 32.0  }
 0x2d6   :  { %v1265_v21 = vpop.eup %1264  ;;  %v634_v15 = vmul.f32 %v1646_v43, %v626_v6  ;;  %v627_v25 = vmul.f32 8.0, %v1263_v18  ;;  %1266 = vpow2.f32 %v616_v5  ;;  %v618_v28 = vmul.f32 1.442695, %v605_v20 }
 0x2d7   :  { %v583_v52 = vmul.f32 0.6931472, %v1265_v21  ;;  %1268 = vpow2.f32 %v620_v19 }
 0x2d8   :  { %1158 = vmatmul.msk.f32.vlgmr.msra.gmra.mxu0 %vm135_vm1, %v634_v15  ;;  %v635_v50 = vmul.f32 %v1652_v31, %v627_v25  ;;  %1270 = vpow2.f32 %v618_v28 }
 0x2d9   :  { %v591_v22 = vadd.f32 %v583_v52, %v1656_v46  ;;  %1174 = vmatpush.msk.msra.mxu0 %vm836_vm2, %v1422_v29 }
 0x2da   :  { %1159 = vmatmul.msk.f32.vlgmr.msrb.gmra.mxu1 %vm135_vm1, %v635_v50 }
 0x2db   :  { %v599_v27 = vsub.f32 -2.0794415, %v591_v22  ;;  %1177 = vmatpush.msk.msrb.mxu1 %vm873_vm5, %v1422_v29 }
 0x2dc   :  { %v1267_v24 = vpop.eup %1266 }
 0x2dd   :  { %v1269_v30 = vpop.eup %1268  ;;  %v628_v43 = vmul.f32 8.0, %v1267_v24  ;;  %v607_v32 = vadd.f32 %v599_v27, %v1656_v46 }
 0x2de   :  { %v1271_v35 = vpop.eup %1270  ;;  %v630_v26 = vmul.f32 8.0, %v1269_v30 }
 0x2df   :  { %v636_v37 = vmul.f32 %v1659_v48, %v628_v43  ;;  %v629_v38 = vmul.f32 8.0, %v1271_v35  ;;  %v622_v40 = vmul.f32 1.442695, %v607_v32  ;;  %v1030_v43 = vld [vmem:[#allocation7 + $0x18] sm:$0xff]  ;;  %v1029_v32 = vld [vmem:[#allocation7 + $0x10] sm:$0xff]  ;;  %v1028_v35 = vld [vmem:[#allocation7 + $0x8] sm:$0xff] }
 0x2e0   :  { %v638_v31 = vmul.f32 %v1661_v49, %v630_v26  ;;  %v1027_v26 = vld [vmem:[#allocation7] sm:$0xff] }
 0x2e1   :  { %1160 = vmatmul.msk.f32.vlgmr.msra.gmra.mxu2 %vm135_vm1, %v636_v37  ;;  %v637_v41 = vmul.f32 %v1665_v54, %v629_v38  ;;  %1272 = vpow2.f32 %v622_v40  ;;  %v839_v54 = vadd.s32 8, %v835_v39 }
 0x2e2   :  { %1162 = vmatmul.msk.f32.vlgmr.msrb.gmra.mxu0 %vm135_vm1, %v638_v31  ;;  %1274 = vrcp.f32 %v1423_v4 }
 0x2e3   :  { %1161 = vmatmul.msk.f32.vlgmr.msra.gmra.mxu3 %vm135_vm1, %v637_v41  ;;  %vm840_vm3 = vcmp.eq.s32.totalorder %v833_v0, %v839_v54 }
 0x2e4   :  { %1166 = vmatpush.msk.msrb.mxu2 %vm840_vm3, %v1422_v29 }
 0x2e6   :  { %1050 = vmatpush.msra.mxu2 %v1030_v43 }
 0x2e7   :  { %v1273_v42 = vpop.eup %1272 }
 0x2e8   :  { %v631_v44 = vmul.f32 8.0, %v1273_v42  ;;  %v1275_v6 = vpop.eup %1274  ;;  %1051 = vmatpush.msra.mxu2 %v1029_v32 }
 0x2e9   :  { %v977_v5 = vmul.f32 32.0, %v1275_v6  ;;  %vm981_vm7 = vweird.f32 %v1275_v6 }
 0x2ea   :  { %v639_v46 = vmul.f32 %v1671_v8, %v631_v44  ;;  %1052 = vmatpush.msra.mxu2 %v1028_v35 }
 0x2eb   :  { %v978_v20 = vsub.f32 1.0, %v977_v5 }
 0x2ec   :  { %1163 = vmatmul.msk.f32.vlgmr.msra.gmra.mxu1 %vm135_vm1, %v639_v46  ;;  %1053 = vmatpush.msra.mxu2 %v1027_v26 }
 0x2ed   :  { %v660_v48 = vpop.f32.mrf.mxu2  ;;  %v979_v18 = vmul.f32 %v1275_v6, %v978_v20 }
 0x2ee   :  { %v824_v45 = vadd.f32 %v660_v48, %v1471_v7 }
 0x2ef   :  { %v980_v19 = vadd.f32 %v1275_v6, %v979_v18 }
 0x2f0   :  { %1175 = vmatmul.msk.f32.vlgmr.msra.gmra.mxu0 %vm135_vm1, %v824_v45 }
 0x2f1   :  { %v1717_v21 = vsel %vm981_vm7, %v1275_v6, %v980_v19 }
 0x2f4   :  { %v683_v49 = vpop.f32.mrf.mxu3 }
 0x2f5   :  { %v825_v47 = vadd.f32 %v683_v49, %v1478_v9 }
 0x2f8   :  { %1176 = vmatmul.msk.f32.gmra.mxu0 %vm135_vm1, %v825_v47 }
 0x355   :  { %v706_v8 = vpop.f32.mrf.mxu0 }
 0x356   :  { %v826_v51 = vadd.f32 %v706_v8, %v1491_v11 }
 0x357   :  { %v729_v7 = vpop.f32.mrf.mxu1 }
 0x358   :  { %1167 = vmatmul.msk.f32.vlgmr.msrb.gmra.mxu2 %vm135_vm1, %v826_v51  ;;  %v827_v23 = vadd.f32 %v729_v7, %v1500_v12 }
 0x35f   :  { %v798_v9 = vpop.f32.mrf.mxu0 }
 0x360   :  { %v830_v53 = vadd.f32 %v798_v9, %v1524_v17  ;;  %1168 = vmatmul.msk.f32.gmra.mxu2 %vm135_vm1, %v827_v23  ;;  %v1024_v23 = vperm.slane %v1725_v56, 3 }
 0x362   :  { %1172 = vmatmul.msk.f32.vlgmr.msrb.gmra.mxu3 %vm135_vm1, %v830_v53 }
 0x364   :  { %v752_v34 = vpop.f32.mrf.mxu2 }
 0x365   :  { %v828_v55 = vadd.f32 %v752_v34, %v1504_v14 }
 0x366   :  { %v775_v57 = vpop.f32.mrf.mxu3 }
 0x367   :  { %1178 = vmatmul.msk.f32.vlgmr.msrb.gmra.mxu1 %vm135_vm1, %v828_v55  ;;  %v829_v12 = vadd.f32 %v775_v57, %v1489_v10 }
 0x369   :  { %v821_v36 = vpop.f32.mrf.mxu1 }
 0x36a   :  { %v831_v11 = vadd.f32 %v821_v36, %v1502_v13 }
 0x36c   :  { %1173 = vmatmul.msk.f32.gmra.mxu3 %vm135_vm1, %v831_v11 }
 0x36d   :  { %v932_v16 = vpop.f32.mrf.mxu0 }
 0x36f   :  { %1179 = vmatmul.msk.f32.gmra.mxu1 %vm135_vm1, %v829_v12 }
 0x375   :  { %v935_v0 = vpop.f32.mrf.mxu0 }
 0x3db   :  { %v866_v17 = vpop.f32.mrf.mxu2 }
 0x3dc   :  { %v933_v62 = vadd.f32 %v932_v16, %v866_v17 }
 0x3e3   :  { %v869_v60 = vpop.f32.mrf.mxu2 }
 0x3e4   :  { %v961_v33 = vpop.f32.mrf.mxu1  ;;  %v936_v1 = vadd.f32 %v935_v0, %v869_v60 }
 0x3e5   :  { %v903_v61 = vpop.f32.mrf.mxu3 }
 0x3e6   :  { %v962_v59 = vadd.f32 %v961_v33, %v903_v61  ;;  %v1031_v33 = vperm.slane %v1725_v56, 1 }
 0x3e8   :  { %v967_v14 = vadd.f32 %v962_v59, %v933_v62 }
 0x3ea   :  { %v970_v63 = vsel %vm969_vm6, %v967_v14, 0.0 }
 0x3eb   :  { %971 = vadd.xlane.f32.xlu0 %v970_v63 }
 0x3ec   :  { %v964_v13 = vpop.f32.mrf.mxu1 }
 0x3ef   :  { %v906_v39 = vpop.f32.mrf.mxu3 }
 0x3f0   :  { %v965_v2 = vadd.f32 %v964_v13, %v906_v39 }
 0x3f2   :  { %v968_v10 = vadd.f32 %v965_v2, %v936_v1 }
 0x3f4   :  { %v973_v3 = vsel %vm969_vm6, %v968_v10, 0.0 }
 0x3f5   :  { %974 = vadd.xlane.f32.xlu1 %v973_v3 }
 0x45e   :  { %v972_v15 = vpop.xlane.xlu0 %971 }
 0x45f   :  { %v983_v25 = vmul.f32 %v1717_v21, %v972_v15 }
 0x461   :  { %v985_v28 = vsub.f32 %v967_v14, %v983_v25 }
 0x463   :  { %v987_v52 = vmul.f32 %v985_v28, %v985_v28 }
 0x465   :  { %v989_v50 = vsel %vm969_vm6, %v987_v52, 0.0 }
 0x466   :  { %990 = vadd.xlane.f32.xlu2 %v989_v50 }
 0x468   :  { %v975_v22 = vpop.xlane.xlu1 %974 }
 0x469   :  { %v984_v29 = vmul.f32 %v1717_v21, %v975_v22 }
 0x46b   :  { %v986_v27 = vsub.f32 %v968_v10, %v984_v29 }
 0x46d   :  { %v988_v24 = vmul.f32 %v986_v27, %v986_v27 }
 0x46f   :  { %v992_v30 = vsel %vm969_vm6, %v988_v24, 0.0 }
 0x470   :  { %993 = vadd.xlane.f32.xlu0 %v992_v30 }
 0x4d9   :  { %v991_v37 = vpop.xlane.xlu2 %990 }
 0x4da   :  { %v995_v38 = vmul.f32 %v991_v37, %v1717_v21  ;;  %v1109_v37 = vperm.slane %v1725_v56, 4 }
 0x4dc   :  { %v997_v40 = vadd.f32 1e-05, %v995_v38 }
 0x4de   :  { %1276 = vrsqrt.f32 %v997_v40  ;;  %vm1005_vm9 = vweird.f32 %v997_v40 }
 0x4e3   :  { %v994_v31 = vpop.xlane.xlu0 %993 }
 0x4e4   :  { %v1277_v41 = vpop.eup %1276  ;;  %v996_v42 = vmul.f32 %v994_v31, %v1717_v21 }
 0x4e5   :  { %v1000_v44 = vmul.f32 %v1277_v41, %v997_v40  ;;  %vm1006_vm8 = vweird.f32 %v1277_v41 }
 0x4e6   :  { %v998_v46 = vadd.f32 1e-05, %v996_v42  ;;  %vm1007_vm10 = vmor %vm1005_vm9, %vm1006_vm8 }
 0x4e7   :  { %v1001_v48 = vmul.f32 %v1277_v41, %v1000_v44 }
 0x4e8   :  { %1278 = vrsqrt.f32 %v998_v46  ;;  %vm1015_vm12 = vweird.f32 %v998_v46 }
 0x4e9   :  { %v1002_v45 = vmul.f32 0.5, %v1001_v48 }
 0x4eb   :  { %v1003_v49 = vsub.f32 1.5, %v1002_v45 }
 0x4ed   :  { %v1004_v47 = vmul.f32 %v1277_v41, %v1003_v49 }
 0x4ee   :  { %v1279_v54 = vpop.eup %1278 }
 0x4ef   :  { %v1008_v8 = vsel %vm1007_vm10, %v1277_v41, %v1004_v47  ;;  %v1010_v51 = vmul.f32 %v1279_v54, %v998_v46  ;;  %vm1016_vm11 = vweird.f32 %v1279_v54  ;;  %v1112_v41 = vperm.slane %v1725_v56, 5 }
 0x4f0   :  { %v1019_v7 = vmul.f32 %v1008_v8, %v985_v28  ;;  %vm1017_vm13 = vmor %vm1015_vm12, %vm1016_vm11 }
 0x4f1   :  { %v1011_v9 = vmul.f32 %v1279_v54, %v1010_v51 }
 0x4f2   :  { %v1022_v53 = vmul.f32 %v1021_v58, %v1019_v7 }
 0x4f3   :  { %v1012_v34 = vmul.f32 0.5, %v1011_v9 }
 0x4f4   :  { %v1025_v55 = vadd.f32 %v1024_v23, %v1022_v53 }
 0x4f5   :  { %v1013_v36 = vsub.f32 1.5, %v1012_v34 }
 0x4f6   :  { %1180 = vmatmul.msk.f32.vlgmr.msra.gmra.mxu2 %vm969_vm6, %v1025_v55 }
 0x4f7   :  { %v1014_v57 = vmul.f32 %v1279_v54, %v1013_v36 }
 0x4f9   :  { %v1018_v11 = vsel %vm1017_vm13, %v1279_v54, %v1014_v57 }
 0x4fa   :  { %v1020_v12 = vmul.f32 %v1018_v11, %v986_v27 }
 0x4fc   :  { %v1023_v17 = vmul.f32 %v1021_v58, %v1020_v12 }
 0x4fe   :  { %v1026_v16 = vadd.f32 %v1024_v23, %v1023_v17 }
 0x500   :  { %1181 = vmatmul.msk.f32.gmra.mxu2 %vm969_vm6, %v1026_v16 }
 0x579   :  { %v1055_v61 = vpop.f32.mrf.mxu2 }
 0x57a   :  { %v1056_v62 = vadd.f32 %v1055_v61, %v1031_v33 }
 0x57c   :  { %v1061_v59 = vmax.f32 %v1056_v62, 0.0 }
 0x57e   :  { %v1063_v14 = vadd.f32 %v1061_v59, %v1025_v55 }
 0x580   :  { %v1065_v63 = vsel %vm969_vm6, %v1063_v14, 0.0 }
 0x581   :  { %1066 = vadd.xlane.f32.xlu1 %v1065_v63 }
 0x583   :  { %v1058_v60 = vpop.f32.mrf.mxu2 }
 0x584   :  { %v1059_v0 = vadd.f32 %v1058_v60, %v1031_v33 }
 0x586   :  { %v1062_v13 = vmax.f32 %v1059_v0, 0.0 }
 0x588   :  { %v1064_v39 = vadd.f32 %v1062_v13, %v1026_v16 }
 0x58a   :  { %v1068_v1 = vsel %vm969_vm6, %v1064_v39, 0.0 }
 0x58b   :  { %1069 = vadd.xlane.f32.xlu2 %v1068_v1 }
 0x5f4   :  { %v1067_v2 = vpop.xlane.xlu1 %1066 }
 0x5f5   :  { %v1071_v10 = vmul.f32 %v1067_v2, %v1717_v21 }
 0x5f7   :  { %v1073_v3 = vsub.f32 %v1063_v14, %v1071_v10 }
 0x5f9   :  { %v1075_v4 = vmul.f32 %v1073_v3, %v1073_v3 }
 0x5fb   :  { %v1077_v6 = vsel %vm969_vm6, %v1075_v4, 0.0 }
 0x5fc   :  { %1078 = vadd.xlane.f32.xlu0 %v1077_v6 }
 0x5fe   :  { %v1070_v5 = vpop.xlane.xlu2 %1069 }
 0x5ff   :  { %v1072_v20 = vmul.f32 %v1070_v5, %v1717_v21 }
 0x601   :  { %v1074_v18 = vsub.f32 %v1064_v39, %v1072_v20 }
 0x603   :  { %v1076_v19 = vmul.f32 %v1074_v18, %v1074_v18 }
 0x605   :  { %v1080_v15 = vsel %vm969_vm6, %v1076_v19, 0.0 }
 0x606   :  { %1081 = vadd.xlane.f32.xlu1 %v1080_v15 }
 0x66f   :  { %v1079_v25 = vpop.xlane.xlu0 %1078 }
 0x670   :  { %v1083_v28 = vmul.f32 %v1079_v25, %v1717_v21 }
 0x672   :  { %v1085_v52 = vadd.f32 1e-05, %v1083_v28 }
 0x674   :  { %1280 = vrsqrt.f32 %v1085_v52  ;;  %vm1093_vm15 = vweird.f32 %v1085_v52 }
 0x679   :  { %v1082_v50 = vpop.xlane.xlu1 %1081 }
 0x67a   :  { %v1281_v22 = vpop.eup %1280  ;;  %v1084_v29 = vmul.f32 %v1082_v50, %v1717_v21 }
 0x67b   :  { %v1088_v27 = vmul.f32 %v1281_v22, %v1085_v52  ;;  %vm1094_vm14 = vweird.f32 %v1281_v22 }
 0x67c   :  { %v1086_v24 = vadd.f32 1e-05, %v1084_v29  ;;  %vm1095_vm0 = vmor %vm1093_vm15, %vm1094_vm14 }
 0x67d   :  { %v1089_v30 = vmul.f32 %v1281_v22, %v1088_v27 }
 0x67e   :  { %1282 = vrsqrt.f32 %v1086_v24  ;;  %vm1103_vm2 = vweird.f32 %v1086_v24 }
 0x67f   :  { %v1090_v43 = vmul.f32 0.5, %v1089_v30 }
 0x681   :  { %v1091_v32 = vsub.f32 1.5, %v1090_v43 }
 0x683   :  { %v1092_v35 = vmul.f32 %v1281_v22, %v1091_v32 }
 0x684   :  { %v1283_v26 = vpop.eup %1282 }
 0x685   :  { %v1096_v38 = vsel %vm1095_vm0, %v1281_v22, %v1092_v35  ;;  %v1098_v40 = vmul.f32 %v1283_v26, %v1086_v24  ;;  %vm1104_vm1 = vweird.f32 %v1283_v26 }
 0x686   :  { %v1107_v31 = vmul.f32 %v1096_v38, %v1073_v3  ;;  %vm1105_vm3 = vmor %vm1103_vm2, %vm1104_vm1 }
 0x687   :  { %v1099_v42 = vmul.f32 %v1283_v26, %v1098_v40 }
 0x688   :  { %v1110_v21 = vmul.f32 %v1109_v37, %v1107_v31 }
 0x689   :  { %v1100_v44 = vmul.f32 0.5, %v1099_v42 }
 0x68a   :  { %v1113_v46 = vadd.f32 %v1112_v41, %v1110_v21 }
 0x68b   :  { %v1101_v48 = vsub.f32 1.5, %v1100_v44 }
 0x68c   :  { %1115 = vst.msk [vmem:[#allocation10] sm:$0xff] %vm969_vm6, %v1113_v46 }
 0x68d   :  { %v1102_v45 = vmul.f32 %v1283_v26, %v1101_v48 }
 0x68f   :  { %v1106_v49 = vsel %vm1105_vm3, %v1283_v26, %v1102_v45 }
 0x690   :  { %v1108_v47 = vmul.f32 %v1106_v49, %v1074_v18 }
 0x692   :  { %v1111_v54 = vmul.f32 %v1109_v37, %v1108_v47 }
 0x694   :  { %v1114_v56 = vadd.f32 %v1112_v41, %v1111_v54 }
 0x696   :  { %1116 = vst.msk [vmem:[#allocation10 + $0x8] sm:$0xff] %vm969_vm6, %v1114_v56 }
 0x697   :  { %1129 = dma.vmem_to_hbm [thread:$0]  %s1122_s11, 256, %s1124_s14, [#allocation4], %s1414_s23, %s1414_s23, %s1415_s24  }
 0x698   :  { %1411 = dma.done.wait [#allocation4], 256  }
 0x699   :  { %1412 = vsyncadd [#allocation4], 4294967040 }
 0x69a   :  { %1134 = vsyncpa [#allocation3], 1 }
 0x69b   :  { %1135 = vsyncpa [#allocation6], 1 }
 0x69c   :  { %1136 = vsyncpa [#allocation9], 1 }
 0x69d   :  { %1137 = vsyncpa [#allocation4], 1 }

</bundles_post_ra>
